<compile_context>
chip_gen: v5e
topology: v5e:2x2
jax: 0.10.0
libtpu: 0.0.40
codegen_flags: <defaults>
</compile_context>

<pallas_src>
import functools

import jax
import jax.numpy as jnp
from jax.experimental import pallas as pl
from jax.experimental.pallas import tpu as pltpu


_LANE = 128


def _round_up(x: int, m: int) -> int:
    return ((x + m - 1) // m) * m


def _sublane_multiple(dtype) -> int:
    # f32 vreg = [8,128]; bf16 packs 16 rows; 8-bit (int8/fp8) packs 32.
    return {4: 8, 2: 16, 1: 32}.get(jnp.dtype(dtype).itemsize, 8)


def _largest_divisor_tile(dim: int, candidates) -> int | None:
    for c in candidates:
        if c <= dim and dim % c == 0:
            return c
    return None


def _vmem_footprint_bytes(tm, tn, tk, op_bytes, out_bytes) -> int:
    """Double-buffered input/output blocks + resident f32 accumulator."""
    x_blk = tm * tk * op_bytes
    w_blk = tk * tn * op_bytes
    b_blk = tn * 4
    o_blk = tm * tn * out_bytes
    acc = tm * tn * 4
    return 2 * (x_blk + w_blk + b_blk + o_blk) + acc


def _pick_tiles(B, in_f, out_f, operand_dtype, out_dtype):
    sub = _sublane_multiple(operand_dtype)
    op_bytes = jnp.dtype(operand_dtype).itemsize
    out_bytes = jnp.dtype(out_dtype).itemsize

    # --- K (reduction): big lane-dense tiles when 128-aligned; otherwise a
    # single full-extent block so the activations never need a per-forward pad.
    tk = (_largest_divisor_tile(in_f, (1024, 512, 256, 128))
          if in_f % _LANE == 0 else None)
    if tk is None:
        tk = in_f
        # TODO(synk): a huge, non-128-aligned in_features would need a one-time
        # padded weight plus a per-forward padded x; not needed at these sizes.

    # --- N: widest lane-dense tile that divides out_f (small-batch FC is
    # weight-stream bound, so wide N tiles stream W once per M tile);
    # full-extent block when out_f is not 128-aligned.
    tn = (_largest_divisor_tile(out_f, (1024, 512, 256, 128))
          if out_f % _LANE == 0 else None)
    if tn is None:
        tn = out_f

    # --- M: full-extent for small batch (no pad, no slice); 512-row tiles
    # rounded to the operand's sublane packing otherwise.
    tm = B if B <= 512 else _round_up(512, sub)

    # --- Shrink tiles if the double-buffered footprint would not fit a
    # v7x-safe budget (64 MiB physical VMEM per TensorCore).
    budget = 44 * 1024 * 1024

    def fits(tm_, tn_, tk_):
        return _vmem_footprint_bytes(tm_, tn_, tk_, op_bytes, out_bytes) <= budget

    while not fits(tm, tn, tk) and tk % (2 * _LANE) == 0:
        tk //= 2
    while not fits(tm, tn, tk) and tn % (2 * _LANE) == 0:
        tn //= 2
    while not fits(tm, tn, tk) and tm % (2 * sub) == 0:
        tm //= 2

    # --- v7x has 2 TensorCores: avoid a (1, 1, K) grid when a parallel axis
    # can legally be split into two lane/sublane-dense tiles.
    if pl.cdiv(B, tm) == 1 and out_f // tn == 1:
        if tn % (2 * _LANE) == 0:
            tn //= 2
        elif tm % (2 * sub) == 0:
            tm //= 2

    return tm, tn, tk


def _fc_relu_kernel(x_ref, w_ref, b_ref, o_ref, acc_ref):
    """One (tm, tn) output tile; accumulate over the K grid axis (axis 2)."""
    k = pl.program_id(2)

    @pl.when(k == 0)
    def _():
        # Bias-initialized accumulator: the epilogue is just ReLU + store.
        acc_ref[...] = jnp.broadcast_to(b_ref[...], acc_ref.shape)

    x = x_ref[...]
    if x.dtype != w_ref.dtype:
        # In-VMEM cast (VPU) -> MXU runs at its bf16 peak without an extra
        # wrapper-side HBM pass over the activations.
        x = x.astype(w_ref.dtype)
    acc_ref[...] += jnp.dot(x, w_ref[...], preferred_element_type=jnp.float32)

    @pl.when(k == pl.num_programs(2) - 1)
    def _():
        o_ref[...] = jnp.maximum(acc_ref[...], 0.0).astype(o_ref.dtype)


def prepare_fc_params(weight, bias, *, operand_dtype=jnp.bfloat16):
    """One-time conversion of PyTorch-layout Linear params for the kernel.

    weight: [out, in]  ->  w_t: [in, out]  (transposed, cast to operand dtype)
    bias:   [out]      ->  b2:  [1, out]   (f32, matches the f32 accumulator)
    Do this at model-init time so the transpose/cast is never paid per forward.
    operand_dtype=jnp.bfloat16 is the production default (MXU bf16 peak);
    pass jnp.float32 for an exact-precision path.
    """
    out_f, in_f = weight.shape
    w_t = weight.T.astype(operand_dtype)
    b2 = bias.astype(jnp.float32).reshape(1, out_f)
    return w_t, b2


def full_connect_basic_block(x, w_t, b2, *, out_dtype=None, tiles=None):
    """y = relu(x @ W^T + b) with pre-prepared (transposed) params.

    x:   [B, in_features]   (any float dtype; cast to w_t.dtype inside VMEM)
    w_t: [in_features, out_features]   (from prepare_fc_params)
    b2:  [1, out_features]  float32
    """
    B, in_f = x.shape
    k_w, out_f = w_t.shape
    assert k_w == in_f, "weight/input feature mismatch"
    out_dtype = out_dtype or x.dtype

    if tiles is not None:
        tm, tn, tk = tiles
        assert in_f % tk == 0 and out_f % tn == 0
    else:
        tm, tn, tk = _pick_tiles(B, in_f, out_f, w_t.dtype, out_dtype)

    # Ragged *large* batch only: pad the activations' M dim (rare; K/N never
    # need a per-forward pad, and the common paths need no pad at all).
    m = B
    if B > tm and B % tm != 0:
        m = _round_up(B, tm)
        x = jnp.pad(x, ((0, m - B), (0, 0)))

    grid = (m // tm, out_f // tn, in_f // tk)  # K (reduction) last

    op_bytes = jnp.dtype(w_t.dtype).itemsize
    out_bytes = jnp.dtype(out_dtype).itemsize
    footprint = _vmem_footprint_bytes(tm, tn, tk, op_bytes, out_bytes)
    # Derive the scoped-VMEM request from the real footprint; cap v7x-safe.
    vmem_limit = int(min(max(32 << 20, footprint + (8 << 20)), 56 << 20))

    cost = pl.CostEstimate(
        flops=2 * m * in_f * out_f,
        transcendentals=0,
        bytes_accessed=(x.size * x.dtype.itemsize
                        + grid[0] * w_t.size * op_bytes   # W streamed per M tile
                        + b2.size * 4
                        + m * out_f * out_bytes),
    )

    out = pl.pallas_call(
        _fc_relu_kernel,
        out_shape=jax.ShapeDtypeStruct((m, out_f), out_dtype),
        grid_spec=pltpu.PrefetchScalarGridSpec(
            num_scalar_prefetch=0,
            grid=grid,
            in_specs=[
                pl.BlockSpec((tm, tk), lambda i, j, k: (i, k)),   # x tile
                pl.BlockSpec((tk, tn), lambda i, j, k: (k, j)),   # W tile
                pl.BlockSpec((1, tn), lambda i, j, k: (0, j)),    # bias tile
            ],
            out_specs=pl.BlockSpec((tm, tn), lambda i, j, k: (i, j)),
            scratch_shapes=[pltpu.VMEM((tm, tn), jnp.float32)],
        ),
        compiler_params=pltpu.CompilerParams(
            dimension_semantics=("parallel", "parallel", "arbitrary"),
            vmem_limit_bytes=vmem_limit,
        ),
        cost_estimate=cost,
    )(x, w_t, b2)

    if m != B:
        out = out[:B]
    return out


if __name__ == "__main__":
    # Small shapes consistent with nn.Linear(input_size, output_size).
    B, in_features, out_features = 8, 32, 64

    key = jax.random.PRNGKey(0)
    kx, kw, kb = jax.random.split(key, 3)

    x = jax.random.normal(kx, (B, in_features), dtype=jnp.float32)
    bound = 1.0 / jnp.sqrt(jnp.float32(in_features))
    weight = jax.random.uniform(
        kw, (out_features, in_features), dtype=jnp.float32,
        minval=-bound, maxval=bound)
    bias = jax.random.uniform(
        kb, (out_features,), dtype=jnp.float32, minval=-bound, maxval=bound)

    ref_f32 = jnp.maximum(x @ weight.T + bias, 0.0)

    # --- Production path: bf16 operands, f32 accumulation (default). -------
    w_bf, b2 = prepare_fc_params(weight, bias)                  # bf16 weights
    out_bf = jax.block_until_ready(full_connect_basic_block(x, w_bf, b2))
    assert out_bf.shape == (B, out_features)
    x_bf = x.astype(jnp.bfloat16).astype(jnp.float32)
    w_bf_f32 = weight.astype(jnp.bfloat16).astype(jnp.float32)
    ref_bf = jnp.maximum(x_bf @ w_bf_f32.T + bias, 0.0)
    assert jnp.allclose(out_bf, ref_bf, atol=2e-3, rtol=2e-3)
    assert jnp.allclose(out_bf, ref_f32, atol=5e-2, rtol=5e-2)

    # --- Exact path: f32 operands, tight reference check. ------------------
    w_f32, b2f = prepare_fc_params(weight, bias, operand_dtype=jnp.float32)
    out_f32 = jax.block_until_ready(full_connect_basic_block(x, w_f32, b2f))
    assert jnp.allclose(out_f32, ref_f32, atol=1e-4, rtol=1e-4)

    # --- Tiled path: 128-aligned dims, multi-step K accumulation + j tiles.
    B2, in2, out2 = 16, 256, 384
    k2 = jax.random.PRNGKey(1)
    kx2, kw2, kb2 = jax.random.split(k2, 3)
    x2 = jax.random.normal(kx2, (B2, in2), dtype=jnp.float32)
    w2 = jax.random.normal(kw2, (out2, in2), dtype=jnp.float32) * 0.05
    b2v = jax.random.normal(kb2, (out2,), dtype=jnp.float32) * 0.05
    w2_bf, b2_2 = prepare_fc_params(w2, b2v)
    out2_k = jax.block_until_ready(
        full_connect_basic_block(x2, w2_bf, b2_2, tiles=(16, 128, 128)))
    ref2 = jnp.maximum(
        x2.astype(jnp.bfloat16).astype(jnp.float32)
        @ w2.astype(jnp.bfloat16).astype(jnp.float32).T + b2v, 0.0)
    assert out2_k.shape == (B2, out2)
    assert jnp.allclose(out2_k, ref2, atol=2e-3, rtol=2e-3)

    print("KERNEL_OK")
</pallas_src>

<mosaic_0001>
module attributes {stable_mosaic.version = 11 : i64} {
  func.func @_fc_relu_kernel(%arg0: i32, %arg1: i32, %arg2: i32, %arg3: memref<8x32xf32, #tpu.memory_space<vmem>>, %arg4: memref<32x64xbf16, #tpu.memory_space<vmem>>, %arg5: memref<1x64xf32, #tpu.memory_space<vmem>>, %arg6: memref<8x64xf32, #tpu.memory_space<vmem>>, %arg7: memref<8x64xf32, #tpu.memory_space<vmem>>) attributes {dimension_semantics = [#tpu.dimension_semantics<parallel>, #tpu.dimension_semantics<parallel>, #tpu.dimension_semantics<arbitrary>], iteration_bounds = array<i64: 1, 1, 1>, scalar_prefetch = 0 : i64, scratch_operands = 1 : i64, tpu.core_type = #tpu.core_type<tc>, window_params = [{transform_indices = @transform_0, window_bounds = array<i64: 8, 32>}, {transform_indices = @transform_1, window_bounds = array<i64: 32, 64>}, {transform_indices = @transform_2, window_bounds = array<i64: 1, 64>}, {transform_indices = @transform_3, window_bounds = array<i64: 8, 64>}]} {
    %c0_i32 = arith.constant 0 : i32
    %0 = arith.cmpi eq, %arg2, %c0_i32 : i32
    %1 = arith.extui %0 : i1 to i32
    %c0_i32_0 = arith.constant 0 : i32
    %2 = arith.cmpi ne, %1, %c0_i32_0 : i32
    scf.if %2 {
      %c0_10 = arith.constant 0 : index
      %c0_11 = arith.constant 0 : index
      %13 = vector.load %arg5[%c0_10, %c0_11] : memref<1x64xf32, #tpu.memory_space<vmem>>, vector<1x64xf32>
      %14 = vector.shape_cast %13 : vector<1x64xf32> to vector<1x64xf32>
      %15 = vector.broadcast %14 : vector<1x64xf32> to vector<8x64xf32>
      %c0_12 = arith.constant 0 : index
      %c0_13 = arith.constant 0 : index
      %16 = vector.load %arg7[%c0_12, %c0_13] : memref<8x64xf32, #tpu.memory_space<vmem>>, vector<8x64xf32>
      tpu.vector_store %arg7[%c0_12, %c0_13], %15 {strides = array<i32>} : memref<8x64xf32, #tpu.memory_space<vmem>>, vector<8x64xf32>,
    } else {
    }
    %c0 = arith.constant 0 : index
    %c0_1 = arith.constant 0 : index
    %3 = vector.load %arg3[%c0, %c0_1] : memref<8x32xf32, #tpu.memory_space<vmem>>, vector<8x32xf32>
    %4 = arith.truncf %3 : vector<8x32xf32> to vector<8x32xbf16>
    %c0_2 = arith.constant 0 : index
    %c0_3 = arith.constant 0 : index
    %5 = vector.load %arg7[%c0_2, %c0_3] : memref<8x64xf32, #tpu.memory_space<vmem>>, vector<8x64xf32>
    %c0_4 = arith.constant 0 : index
    %c0_5 = arith.constant 0 : index
    %6 = vector.load %arg4[%c0_4, %c0_5] : memref<32x64xbf16, #tpu.memory_space<vmem>>, vector<32x64xbf16>
    %cst = arith.constant dense<0.000000e+00> : vector<8x64xf32>
    %7 = tpu.matmul %4, %6, %cst {dimension_numbers = #tpu.dot_dimension_numbers<[1], [0], [0], [1], [0, 0, 1, 1], [], []>} : vector<8x32xbf16>, vector<32x64xbf16>, vector<8x64xf32> -> vector<8x64xf32>
    %8 = arith.addf %5, %7 : vector<8x64xf32>
    %c0_6 = arith.constant 0 : index
    %c0_7 = arith.constant 0 : index
    %9 = vector.load %arg7[%c0_6, %c0_7] : memref<8x64xf32, #tpu.memory_space<vmem>>, vector<8x64xf32>
    tpu.vector_store %arg7[%c0_6, %c0_7], %8 {strides = array<i32>} : memref<8x64xf32, #tpu.memory_space<vmem>>, vector<8x64xf32>,
    %c0_i32_8 = arith.constant 0 : i32
    %10 = arith.cmpi eq, %arg2, %c0_i32_8 : i32
    %11 = arith.extui %10 : i1 to i32
    %c0_i32_9 = arith.constant 0 : i32
    %12 = arith.cmpi ne, %11, %c0_i32_9 : i32
    scf.if %12 {
      %c0_10 = arith.constant 0 : index
      %c0_11 = arith.constant 0 : index
      %13 = vector.load %arg7[%c0_10, %c0_11] : memref<8x64xf32, #tpu.memory_space<vmem>>, vector<8x64xf32>
      %cst_12 = arith.constant 0.000000e+00 : f32
      %14 = vector.broadcast %cst_12 : f32 to vector<8x64xf32>
      %15 = arith.maximumf %13, %14 : vector<8x64xf32>
      %c0_13 = arith.constant 0 : index
      %c0_14 = arith.constant 0 : index
      %16 = vector.load %arg6[%c0_13, %c0_14] : memref<8x64xf32, #tpu.memory_space<vmem>>, vector<8x64xf32>
      tpu.vector_store %arg6[%c0_13, %c0_14], %15 {strides = array<i32>} : memref<8x64xf32, #tpu.memory_space<vmem>>, vector<8x64xf32>,
    } else {
    }
    return
  }
  func.func @transform_0(%arg0: i32, %arg1: i32, %arg2: i32) -> (i32, i32) {
    %c0_i32 = arith.constant 0 : i32
    return %arg0, %arg2 : i32, i32
  }
  func.func @transform_1(%arg0: i32, %arg1: i32, %arg2: i32) -> (i32, i32) {
    %c0_i32 = arith.constant 0 : i32
    return %arg2, %arg1 : i32, i32
  }
  func.func @transform_2(%arg0: i32, %arg1: i32, %arg2: i32) -> (i32, i32) {
    %c0_i32 = arith.constant 0 : i32
    %c0_i32_0 = arith.constant 0 : i32
    return %c0_i32, %arg1 : i32, i32
  }
  func.func @transform_3(%arg0: i32, %arg1: i32, %arg2: i32) -> (i32, i32) {
    %c0_i32 = arith.constant 0 : i32
    return %arg0, %arg1 : i32, i32
  }
}

</mosaic_0001>

<bundles_post_ra>
// kernel: tpu_custom_call.1
= control target key start
LH: loop header
LB: loop body
LE: loop exit
PB: predicated region body
PF: predicated region fallthrough
CT: control target
= control target key end

     0   :  { %8 = vsyncpa [#allocation4], 0  ;;  %s254_s0 = inlined_call_operand.hbm [shape: f32[8,32], index: 0, kind: input, shape index: {}]   ;;  %s255_s1 = inlined_call_operand.hbm [shape: bf16[32,64], index: 1, kind: input, shape index: {}]   ;;  %s256_s2 = inlined_call_operand.vmem [shape: f32[1,64], index: 2, kind: input, shape index: {}]   ;;  %s257_s3 = inlined_call_operand.hbm [shape: f32[8,64], index: 3, kind: output, shape index: {}]  }
   0x1   :  { %9 = vsyncpa [#allocation7], 0 }
   0x2   :  { %10 = vsyncpa [#allocation5], 0  ;;  %s16_s14 = sshll.u32 %s254_s0, 4  ;;  %s214_s15 = smov [#allocation3]   ;;  %s17_s14 = int_to_ptr.hbm [resolvable:$true] %s16_s14 }
   0x3   :  { %s18_s16 = sshll.u32 %s214_s15, 4  ;;  %s26_s19 = sshll.u32 %s255_s1, 4  ;;  %s19_s16 = int_to_ptr.vmem [resolvable:$true] %s18_s16  ;;  %s27_s19 = int_to_ptr.hbm [resolvable:$true] %s26_s19 }
   0x4   :  { %21 = dma.hbm_to_vmem [thread:$0]  %s17_s14, 128, %s19_s16, [#allocation4]  }
   0x5   :  { %s215_s20 = smov [#allocation6]   ;;  %s216_s22 = smov 64  }
   0x6   :  { %s28_s21 = sshll.u32 %s215_s20, 4  ;;  %s217_s23 = smov 4   ;;  %s29_s21 = int_to_ptr.vmem [resolvable:$true] %s28_s21 }
   0x7   :  { %34 = dma.hbm_to_vmem [thread:$0]  %s27_s19, 256, %s29_s21, [#allocation7], %s216_s22, %s216_s22, %s217_s23  }
   0x8   :  { %208 = dma.done.wait [#allocation4], 128  }
   0x9   :  { %209 = vsyncadd [#allocation4], 4294967168 }
   0xa   :  { %210 = dma.done.wait [#allocation7], 256  }
   0xb   :  { %211 = vsyncadd [#allocation7], 4294967040  ;;  %v129_v0 = vld [vmem:[#allocation6 + $0x8] sm:$0xff]  ;;  %vm54_vm0 = vcmask 523264   ;;  %v135_v1 = vld [vmem:[%s256_s2] ss:$0 sm:$0xff] }
   0xc   :  { %85 = vmatpush.bf16.msra.mxu0 %v129_v0  ;;  %v128_v2 = vld [vmem:[#allocation6] sm:$0xff]  ;;  %v56_v3 = vld [vmem:[#allocation3] sm:$0xff]  ;;  %55 = vst.msk [vmem:[#allocation2] sm:$0xff] %vm54_vm0, %v135_v1  ;;  %vm75_vm1 = vcmask 261120   ;;  %s218_s1 = smov [#allocation8]   ;;  %s108_s2 = sshll.u32 %s257_s3, 4  ;;  %s109_s2 = int_to_ptr.hbm [resolvable:$true] %s108_s2 }
   0xd   :  { %v57_v4 = vpack.c.bf16 %v56_v3, %v56_v3  ;;  %s106_s25 = sshll.u32 %s218_s1, 4  ;;  %s107_s25 = int_to_ptr.vmem [resolvable:$true] %s106_s25 }
  0x10   :  { %86 = vmatpush.bf16.msra.mxu0 %v128_v2 }
  0x13   :  { %127 = vmatmul.msk.bf16.vlgmr.msra.gmra.mxu0 %vm75_vm1, %v57_v4  ;;  %v58_v5 = vld [vmem:[#allocation2] sm:$0xff] }
  0x90   :  { %v88_v6 = vpop.f32.mrf.mxu0 }
  0x91   :  { %v92_v7 = vadd.f32 %v88_v6, %v58_v5 }
  0x93   :  { %94 = vst.msk [vmem:[#allocation2] sm:$0xff] %vm54_vm0, %v92_v7 }
  0x98   :  { %v90_v8 = vpop.f32.mrf.mxu0 }
  0x9a   :  { %v98_v9 = vld [vmem:[#allocation2] sm:$0xff] }
  0x9b   :  { %v99_v10 = vmax.f32 %v98_v9, 0.0 }
  0x9d   :  { %100 = vst.msk [vmem:[#allocation8] sm:$0xff] %vm54_vm0, %v99_v10 }
  0x9e   :  { %111 = dma.vmem_to_hbm [thread:$0]  %s107_s25, 128, %s109_s2, [#allocation5]  }
  0x9f   :  { %212 = dma.done.wait [#allocation5], 128  }
  0xa0   :  { %213 = vsyncadd [#allocation5], 4294967168 }
  0xa1   :  { %116 = vsyncpa [#allocation4], 1 }
  0xa2   :  { %117 = vsyncpa [#allocation7], 1 }
  0xa3   :  { %118 = vsyncpa [#allocation5], 1 }

</bundles_post_ra>
